<compile_context>
chip_gen: v6e
topology: v6e:2x2x1
jax: 0.10.0
libtpu: 0.0.40
codegen_flags: <defaults>
</compile_context>

<pallas_src>
import functools
import math

import jax
import jax.numpy as jnp
from jax.experimental import pallas as pl
from jax.experimental.pallas import tpu as pltpu


def _round_up(a, b):
    return (a + b - 1) // b * b


def _choose_block(dim, candidates):
    for c in candidates:
        if dim % c == 0:
            return c
    return dim                      # fall back to the full (untiled) dimension


def _is_v7x():
    try:
        return "v7" in jax.devices()[0].device_kind.lower()
    except Exception:
        return False


def _woq_linear_kernel(x_ref, qw_ref, scb_ref, xsum_ref, o_ref, acc_ref, *,
                       has_bias):
    k = pl.program_id(2)

    # Hot loop: raw int8 weight cast to the activation compute dtype (exact,
    # |q| <= 128) and fed straight to the MXU. No scale / zero-point / rowsum
    # work here.
    x = x_ref[...]                                     # (tm, tk) bf16 (or f32)
    w = qw_ref[...].astype(x.dtype)                    # (tk, tn)
    p = jnp.dot(x, w, preferred_element_type=jnp.float32)

    @pl.when(k == 0)
    def _():
        acc_ref[...] = p                               # direct write, no zero-init

    @pl.when(k > 0)
    def _():
        acc_ref[...] += p

    @pl.when(k == pl.num_programs(2) - 1)
    def _():
        # Epilogue: Y = (x@q) * s - rowsum(x) * (zp*s) [+ bias], once per tile.
        scale = scb_ref[0:1, :]
        zp_scale = scb_ref[1:2, :]
        y = acc_ref[...] * scale - xsum_ref[...] * zp_scale
        if has_bias:
            y = y + scb_ref[2:3, :]
        o_ref[...] = y.astype(o_ref.dtype)


def woq_linear(x, qweight_blocked, scale_zs_bias, *, block_k, block_n,
               tm=None, compute_dtype=jnp.bfloat16):
    """Weight-only-quantized linear: y = x @ dequant(q).T + bias.

    x:               (..., K) float activations.
    qweight_blocked: (K//block_k, N//block_n, block_k, block_n) int8 --
                     block-contiguous repack of the transposed (K, N) weight
                     so each weight tile is one contiguous HBM DMA.
    scale_zs_bias:   (3, N) f32 rows [scale, zp*scale, bias], or (2, N) when
                     there is no bias.
    compute_dtype:   MXU operand dtype. bfloat16 (default, fast) or float32
                     for accuracy-sensitive callers (the default deviates
                     slightly from the fp32 IPEX forward).
    """
    *lead, K = x.shape
    KB, NB, tk, tn = qweight_blocked.shape
    assert tk == block_k and tn == block_n
    assert KB * tk == K, "x feature dim must match packed weight"
    N = NB * tn
    rows = scale_zs_bias.shape[0]
    has_bias = rows == 3
    M = math.prod(lead) if lead else 1

    # M tiling: large tm for prefill-sized M (cuts weight re-streaming by
    # M_pad/tm), minimal padded tm for decode.
    sub = 16 if compute_dtype == jnp.bfloat16 else 8
    if tm is None:
        tm = 512 if M >= 512 else 256
    tm_eff = min(_round_up(tm, sub), _round_up(M, sub))
    M_pad = _round_up(M, tm_eff)

    x2 = x.reshape(M, K).astype(compute_dtype)
    if M_pad != M:
        x2 = jnp.pad(x2, ((0, M_pad - M), (0, 0)))
    # rowsum(x) for the deferred zero-point correction, computed once here
    # instead of per k-step (and per j-tile) inside the kernel.
    xsum = jnp.sum(x2.astype(jnp.float32), axis=1, keepdims=True)   # (M_pad, 1)

    grid = (M_pad // tm_eff, NB, KB)
    out_dtype = x.dtype
    xd = jnp.dtype(compute_dtype).itemsize
    od = jnp.dtype(out_dtype).itemsize

    # Derived VMEM budget: double-buffered tiles + resident f32 accumulator,
    # 50% headroom, clamped to stay safe on v7x's 64 MiB per-TC VMEM.
    tile_bytes = (tm_eff * tk * xd            # x tile
                  + tk * tn                   # int8 weight tile
                  + tm_eff * tn * od          # output tile
                  + 8 * tn * 4                # scale/zp*s/bias (sublane-padded)
                  + tm_eff * 128 * 4)         # rowsum tile (lane-padded)
    vmem_limit = min(max(int((2 * tile_bytes + tm_eff * tn * 4) * 1.5),
                         32 * 1024 * 1024),
                     56 * 1024 * 1024)

    # Truthful bytes_accessed: activations re-streamed per output-column tile,
    # int8 weight re-streamed per row block.
    bytes_accessed = (NB * M_pad * K * xd
                      + (M_pad // tm_eff) * N * K
                      + M_pad * N * od
                      + NB * M_pad * 4
                      + rows * N * 4)

    kernel = functools.partial(_woq_linear_kernel, has_bias=has_bias)

    out = pl.pallas_call(
        kernel,
        out_shape=jax.ShapeDtypeStruct((M_pad, N), out_dtype),
        grid_spec=pltpu.PrefetchScalarGridSpec(
            num_scalar_prefetch=0,
            grid=grid,
            in_specs=[
                pl.BlockSpec((tm_eff, tk), lambda i, j, k: (i, k)),    # x
                # Block-contiguous weight: each (tk, tn) tile is one
                # contiguous HBM run.
                # TODO(synk): add pipeline_mode=pl.Buffered(3) here if
                # profiling shows exposed weight DMA at decode-sized M.
                pl.BlockSpec((None, None, tk, tn),
                             lambda i, j, k: (k, j, 0, 0)),            # q
                pl.BlockSpec((rows, tn), lambda i, j, k: (0, j)),      # s/zp*s/b
                pl.BlockSpec((tm_eff, 1), lambda i, j, k: (i, 0)),     # rowsum(x)
            ],
            out_specs=pl.BlockSpec((tm_eff, tn), lambda i, j, k: (i, j)),
            scratch_shapes=[
                pltpu.VMEM((tm_eff, tn), jnp.float32),    # f32 accumulator
            ],
        ),
        compiler_params=pltpu.CompilerParams(
            dimension_semantics=("parallel", "parallel", "arbitrary"),
            vmem_limit_bytes=vmem_limit),
        cost_estimate=pl.CostEstimate(flops=2 * M_pad * N * K,
                                      transcendentals=0,
                                      bytes_accessed=bytes_accessed),
    )(x2, qweight_blocked, scale_zs_bias, xsum)

    if M_pad != M:
        out = out[:M]
    return out.reshape(*lead, N)


def quantize_per_channel_asym_int8(w):
    """Per-output-channel asymmetric INT8 quantization (group_size = -1).

    w: (N, K) float32 -> qweight int8 (N, K), scales (N,), zero_points (N,)
    Dequant: (q - zp) * scale
    """
    qmin, qmax = -128.0, 127.0
    wmin = jnp.minimum(w.min(axis=1, keepdims=True), 0.0)
    wmax = jnp.maximum(w.max(axis=1, keepdims=True), 0.0)
    scale = (wmax - wmin) / (qmax - qmin)
    scale = jnp.where(scale == 0.0, 1.0, scale)
    zp = jnp.round(qmin - wmin / scale)
    q = jnp.clip(jnp.round(w / scale + zp), qmin, qmax).astype(jnp.int8)
    return q, scale.reshape(-1), zp.reshape(-1)


class WeightOnlyQuantizedLinearPallas:
    """Synthetic WOQ linear: INT8 per-channel asymmetric, group_size=-1."""

    def __init__(self, in_features, out_features, bias_=True, key=None,
                 compute_dtype=jnp.bfloat16):
        self.in_features = in_features
        self.out_features = out_features
        self.compute_dtype = compute_dtype
        key = jax.random.PRNGKey(0) if key is None else key
        kw, kb = jax.random.split(key)
        w_float = jax.random.normal(
            kw, (out_features, in_features), jnp.float32) * 0.05
        self.qweight, self.scales, self.zero_points = \
            quantize_per_channel_asym_int8(w_float)
        self.bias = (jax.random.normal(kb, (out_features,), jnp.float32) * 0.1
                     if bias_ else None)

        # One-time repack: (N, K) int8 -> block-contiguous (KB, NB, tk, tn)
        # so every weight tile the kernel DMAs is contiguous in HBM.
        self.block_k = _choose_block(in_features, (2048, 1024, 512, 256, 128))
        # On dual-TensorCore v7x prefer >= 2 output-column blocks so the
        # "parallel" j axis can shard across cores; on single-TC v5e/v6e keep
        # tn maximal (fewer epilogues, longer DMA runs).
        if _is_v7x() and out_features % 256 == 0 and out_features // 512 < 2:
            tn_candidates = (256, 128)
        else:
            tn_candidates = (512, 256, 128)
        self.block_n = _choose_block(out_features, tn_candidates)
        KB = in_features // self.block_k
        NB = out_features // self.block_n
        q_kn = jnp.asarray(self.qweight).T                       # (K, N)
        self.qweight_blocked = jnp.asarray(
            q_kn.reshape(KB, self.block_k, NB, self.block_n)
                .transpose(0, 2, 1, 3))                          # (KB, NB, tk, tn)

        # Fused epilogue operand: rows = [scale, zp*scale, bias?] (f32, one DMA).
        s = self.scales.astype(jnp.float32).reshape(1, out_features)
        zs = (self.zero_points.astype(jnp.float32)
              * self.scales.astype(jnp.float32)).reshape(1, out_features)
        rows = [s, zs]
        if self.bias is not None:
            rows.append(self.bias.astype(jnp.float32).reshape(1, out_features))
        self.scale_zs_bias = jnp.concatenate(rows, axis=0)

    def __call__(self, x):
        return woq_linear(x, self.qweight_blocked, self.scale_zs_bias,
                          block_k=self.block_k, block_n=self.block_n,
                          compute_dtype=self.compute_dtype)

    def dequant_weight(self):
        return ((self.qweight.astype(jnp.float32)
                 - self.zero_points[:, None]) * self.scales[:, None])


if __name__ == "__main__":
    key = jax.random.PRNGKey(0)
    kx, kmod = jax.random.split(key)

    # Shapes chosen so the k grid axis (K//tk = 3) and j axis (N//tn = 3)
    # are both exercised, while M stays decode-sized (tm_eff = 16).
    batch, seq, in_features, out_features = 2, 8, 3072, 768
    x = jax.random.normal(kx, (batch, seq, in_features), jnp.float32)

    mod = WeightOnlyQuantizedLinearPallas(in_features, out_features,
                                          bias_=True, key=kmod)

    y = jax.block_until_ready(mod(x))
    assert y.shape == (batch, seq, out_features)

    # Reference matched to the kernel's bf16 activation precision.
    w_deq = mod.dequant_weight()                                    # (N, K) f32
    x_bf = x.astype(jnp.bfloat16).astype(jnp.float32).reshape(-1, in_features)
    y_ref = jnp.dot(x_bf, w_deq.T, precision=jax.lax.Precision.HIGHEST) + mod.bias
    y_ref = y_ref.reshape(batch, seq, out_features)
    assert jnp.allclose(y, y_ref, atol=5e-3, rtol=5e-3), \
        "mismatch vs bf16-activation reference"

    # Looser sanity check vs the pure fp32 forward semantics of the module.
    y_ref32 = jnp.dot(x.reshape(-1, in_features), w_deq.T,
                      precision=jax.lax.Precision.HIGHEST) + mod.bias
    y_ref32 = y_ref32.reshape(batch, seq, out_features)
    assert jnp.allclose(y, y_ref32, atol=5e-2, rtol=5e-2), \
        "mismatch vs fp32 reference"

    print("KERNEL_OK")
</pallas_src>

<mosaic_0001>
module attributes {stable_mosaic.version = 11 : i64} {
  func.func @_woq_linear_kernel(%arg0: i32, %arg1: i32, %arg2: i32, %arg3: memref<16x1024xbf16, #tpu.memory_space<vmem>>, %arg4: memref<1x1x1024x256xi8, #tpu.memory_space<vmem>>, %arg5: memref<3x256xf32, #tpu.memory_space<vmem>>, %arg6: memref<16x1xf32, #tpu.memory_space<vmem>>, %arg7: memref<16x256xf32, #tpu.memory_space<vmem>>, %arg8: memref<16x256xf32, #tpu.memory_space<vmem>>) attributes {dimension_semantics = [#tpu.dimension_semantics<parallel>, #tpu.dimension_semantics<parallel>, #tpu.dimension_semantics<arbitrary>], iteration_bounds = array<i64: 1, 3, 3>, scalar_prefetch = 0 : i64, scratch_operands = 1 : i64, tpu.core_type = #tpu.core_type<tc>, window_params = [{transform_indices = @transform_0, window_bounds = array<i64: 16, 1024>}, {transform_indices = @transform_1, window_bounds = array<i64: 1, 1, 1024, 256>}, {transform_indices = @transform_2, window_bounds = array<i64: 3, 256>}, {transform_indices = @transform_3, window_bounds = array<i64: 16, 1>}, {transform_indices = @transform_4, window_bounds = array<i64: 16, 256>}]} {
    %c0 = arith.constant 0 : index
    %c0_0 = arith.constant 0 : index
    %0 = vector.load %arg3[%c0, %c0_0] : memref<16x1024xbf16, #tpu.memory_space<vmem>>, vector<16x1024xbf16>
    %c0_1 = arith.constant 0 : index
    %c0_2 = arith.constant 0 : index
    %c0_3 = arith.constant 0 : index
    %c0_4 = arith.constant 0 : index
    %1 = vector.load %arg4[%c0_1, %c0_2, %c0_3, %c0_4] : memref<1x1x1024x256xi8, #tpu.memory_space<vmem>>, vector<1x1x1024x256xi8>
    %2 = vector.shape_cast %1 : vector<1x1x1024x256xi8> to vector<1024x256xi8>
    %3 = arith.sitofp %2 : vector<1024x256xi8> to vector<1024x256xbf16>
    %cst = arith.constant dense<0.000000e+00> : vector<16x256xf32>
    %4 = tpu.matmul %0, %3, %cst {dimension_numbers = #tpu.dot_dimension_numbers<[1], [0], [0], [1], [0, 0, 1, 1], [], []>} : vector<16x1024xbf16>, vector<1024x256xbf16>, vector<16x256xf32> -> vector<16x256xf32>
    %c0_i32 = arith.constant 0 : i32
    %5 = arith.cmpi eq, %arg2, %c0_i32 : i32
    %6 = arith.extui %5 : i1 to i32
    %c0_i32_5 = arith.constant 0 : i32
    %7 = arith.cmpi ne, %6, %c0_i32_5 : i32
    scf.if %7 {
      %c0_9 = arith.constant 0 : index
      %c0_10 = arith.constant 0 : index
      %14 = vector.load %arg8[%c0_9, %c0_10] : memref<16x256xf32, #tpu.memory_space<vmem>>, vector<16x256xf32>
      tpu.vector_store %arg8[%c0_9, %c0_10], %4 {strides = array<i32>} : memref<16x256xf32, #tpu.memory_space<vmem>>, vector<16x256xf32>,
    } else {
    }
    %c0_i32_6 = arith.constant 0 : i32
    %8 = arith.cmpi sgt, %arg2, %c0_i32_6 : i32
    %9 = arith.extui %8 : i1 to i32
    %c0_i32_7 = arith.constant 0 : i32
    %10 = arith.cmpi ne, %9, %c0_i32_7 : i32
    scf.if %10 {
      %c0_9 = arith.constant 0 : index
      %c0_10 = arith.constant 0 : index
      %14 = vector.load %arg8[%c0_9, %c0_10] : memref<16x256xf32, #tpu.memory_space<vmem>>, vector<16x256xf32>
      %15 = arith.addf %14, %4 : vector<16x256xf32>
      %c0_11 = arith.constant 0 : index
      %c0_12 = arith.constant 0 : index
      %16 = vector.load %arg8[%c0_11, %c0_12] : memref<16x256xf32, #tpu.memory_space<vmem>>, vector<16x256xf32>
      tpu.vector_store %arg8[%c0_11, %c0_12], %15 {strides = array<i32>} : memref<16x256xf32, #tpu.memory_space<vmem>>, vector<16x256xf32>,
    } else {
    }
    %c2_i32 = arith.constant 2 : i32
    %11 = arith.cmpi eq, %arg2, %c2_i32 : i32
    %12 = arith.extui %11 : i1 to i32
    %c0_i32_8 = arith.constant 0 : i32
    %13 = arith.cmpi ne, %12, %c0_i32_8 : i32
    scf.if %13 {
      %c0_9 = arith.constant 0 : index
      %c0_10 = arith.constant 0 : index
      %14 = vector.load %arg5[%c0_9, %c0_10] : memref<3x256xf32, #tpu.memory_space<vmem>>, vector<1x256xf32>
      %c1 = arith.constant 1 : index
      %c0_11 = arith.constant 0 : index
      %15 = vector.load %arg5[%c1, %c0_11] : memref<3x256xf32, #tpu.memory_space<vmem>>, vector<1x256xf32>
      %c0_12 = arith.constant 0 : index
      %c0_13 = arith.constant 0 : index
      %16 = vector.load %arg8[%c0_12, %c0_13] : memref<16x256xf32, #tpu.memory_space<vmem>>, vector<16x256xf32>
      %17 = vector.broadcast %14 : vector<1x256xf32> to vector<16x256xf32>
      %18 = arith.mulf %16, %17 : vector<16x256xf32>
      %c0_14 = arith.constant 0 : index
      %c0_15 = arith.constant 0 : index
      %19 = vector.load %arg6[%c0_14, %c0_15] : memref<16x1xf32, #tpu.memory_space<vmem>>, vector<16x1xf32>
      %20 = vector.broadcast %19 : vector<16x1xf32> to vector<16x256xf32>
      %21 = vector.broadcast %15 : vector<1x256xf32> to vector<16x256xf32>
      %22 = arith.mulf %20, %21 : vector<16x256xf32>
      %23 = arith.subf %18, %22 : vector<16x256xf32>
      %c2 = arith.constant 2 : index
      %c0_16 = arith.constant 0 : index
      %24 = vector.load %arg5[%c2, %c0_16] : memref<3x256xf32, #tpu.memory_space<vmem>>, vector<1x256xf32>
      %25 = vector.broadcast %24 : vector<1x256xf32> to vector<16x256xf32>
      %26 = arith.addf %23, %25 : vector<16x256xf32>
      %c0_17 = arith.constant 0 : index
      %c0_18 = arith.constant 0 : index
      %27 = vector.load %arg7[%c0_17, %c0_18] : memref<16x256xf32, #tpu.memory_space<vmem>>, vector<16x256xf32>
      tpu.vector_store %arg7[%c0_17, %c0_18], %26 {strides = array<i32>} : memref<16x256xf32, #tpu.memory_space<vmem>>, vector<16x256xf32>,
    } else {
    }
    return
  }
  func.func @transform_0(%arg0: i32, %arg1: i32, %arg2: i32) -> (i32, i32) {
    %c0_i32 = arith.constant 0 : i32
    return %arg0, %arg2 : i32, i32
  }
  func.func @transform_1(%arg0: i32, %arg1: i32, %arg2: i32) -> (i32, i32, i32, i32) {
    %c0_i32 = arith.constant 0 : i32
    %c0_i32_0 = arith.constant 0 : i32
    %c0_i32_1 = arith.constant 0 : i32
    return %arg2, %arg1, %c0_i32, %c0_i32_0 : i32, i32, i32, i32
  }
  func.func @transform_2(%arg0: i32, %arg1: i32, %arg2: i32) -> (i32, i32) {
    %c0_i32 = arith.constant 0 : i32
    %c0_i32_0 = arith.constant 0 : i32
    return %c0_i32, %arg1 : i32, i32
  }
  func.func @transform_3(%arg0: i32, %arg1: i32, %arg2: i32) -> (i32, i32) {
    %c0_i32 = arith.constant 0 : i32
    %c0_i32_0 = arith.constant 0 : i32
    return %arg0, %c0_i32 : i32, i32
  }
  func.func @transform_4(%arg0: i32, %arg1: i32, %arg2: i32) -> (i32, i32) {
    %c0_i32 = arith.constant 0 : i32
    return %arg0, %arg1 : i32, i32
  }
}

</mosaic_0001>

<bundles_post_ra>
// kernel: tpu_custom_call.1
= control target key start
LH: loop header
LB: loop body
LE: loop exit
PB: predicated region body
PF: predicated region fallthrough
CT: control target
= control target key end

     0   :  { %s1956_s0 = inlined_call_operand.hbm [shape: bf16[16,3072], index: 0, kind: input, shape index: {}]   ;;  %s1957_s1 = inlined_call_operand.hbm [shape: s8[3,3,1024,256], index: 1, kind: input, shape index: {}]   ;;  %s1958_s2 = inlined_call_operand.hbm [shape: f32[3,768], index: 2, kind: input, shape index: {}]   ;;  %s1959_s3 = inlined_call_operand.vmem [shape: f32[16,1], index: 3, kind: input, shape index: {}]   ;;  %s1960_s4 = inlined_call_operand.hbm [shape: f32[16,768], index: 4, kind: output, shape index: {}]  }
   0x1   :  { %1969 = sst [smem:[#allocation21_spill]] %s1956_s0 }
   0x2   :  { %1970 = sst [smem:[#allocation22_spill]] %s1957_s1 }
   0x3   :  { %1971 = sst [smem:[#allocation23_spill]] %s1958_s2 }
   0x4   :  { %1972 = sst [smem:[#allocation24_spill]] %s1959_s3 }
   0x5   :  { %1973 = sst [smem:[#allocation25_spill]] %s1960_s4 }
   0x6   :  { %9 = vsyncpa [#allocation4], 0 }
   0x7   :  { %11 = vsyncpa [#allocation4 + $0x1], 0 }
   0x8   :  { %12 = vsyncpa [#allocation7], 0 }
   0x9   :  { %14 = vsyncpa [#allocation7 + $0x1], 0 }
   0xa   :  { %15 = vsyncpa [#allocation5], 0 }
   0xb   :  { %17 = vsyncpa [#allocation5 + $0x1], 0  ;;  %s1496_s15 = smov 0   ;;  %s1498_s16 = smov 0  }
   0xc   :  { %s1500_s17 = smov 0   ;;  %s1502_s18 = smov 0  }
   0xd   :  { %s1504_s19 = smov 0   ;;  %s1506_s20 = smov 0  }
   0xe   :  { %s1508_s21 = smov 0   ;;  %s1510_s22 = smov 0  }
   0xf   :  { %s1512_s23 = smov 0   ;;  %s1514_s24 = smov 0  }
  0x10   :  { %s1516_s25 = smov 0   ;;  %s1518_s26 = smov 0  }
  0x11   :  { %s1520_s27 = smov 0   ;;  %s1522_s28 = smov 0  }
  0x12 LB: > { %1974 = sst [smem:[#allocation14_spill]] %s1404_s15  ;;  %s35_s29 = sadd.s32 1, %s1448_s26  ;;  %s1456_s28 = sphi %s1522_s28, %s23_s28   ;;  %s1452_s27 = sphi %s1520_s27, %s2011_s27   ;;  %s1448_s26 = sphi %s1518_s26, %s2010_s26   ;;  %s1444_s25 = sphi %s1516_s25, %s2022_s25   ;;  %s1440_s24 = sphi %s1514_s24, %s2008_s24   ;;  %s1436_s23 = sphi %s1512_s23, %s2021_s23   ;;  %s1432_s22 = sphi %s1510_s22, %s2020_s22   ;;  %s1428_s21 = sphi %s1508_s21, %s2019_s21   ;;  %s1424_s20 = sphi %s1506_s20, %s2018_s20   ;;  %s1420_s19 = sphi %s1504_s19, %s2017_s19   ;;  %s1416_s18 = sphi %s1502_s18, %s2016_s18   ;;  %s1412_s17 = sphi %s1500_s17, %s2015_s17   ;;  %s1408_s16 = sphi %s1498_s16, %s2014_s16   ;;  %s1404_s15 = sphi %s1496_s15, %s2013_s15  }
  0x13   : > { %1975 = sst [smem:[#allocation15_spill]] %s1440_s24  ;;  %s38_s30 = sadd.s32 1, %s1452_s27 }
  0x14   : > { %1976 = sst [smem:[#allocation16_spill]] %s1444_s25  ;;  %p36_p0 = scmp.ge.s32.totalorder %s35_s29, 3 }
  0x15   : > { %1977 = sst [smem:[#allocation17_spill]] %s1448_s26  ;;  %p59_p1 = scmp.eq.s32.totalorder %s1456_s28, 0 }
  0x16   : > { %1978 = sst [smem:[#allocation18_spill]] %s1452_s27  ;;  %s79_s5 = sadd.s32 1, %s1424_s20 }
  0x17   : > { %p86_p2 = scmp.ne.s32.totalorder %s1424_s20, %s1420_s19  ;;  %s2024_s29 = smov (%p36_p0, %s35_s29), 0 }
  0x18   : > { %1979 = sst [smem:[#allocation19_spill]] %s2024_s29  ;;  %s2026_s30 = smov (!%p36_p0, %s38_s30), %s1452_s27 }
  0x19   : > { %s1577_s6 = ssub.s32 %s1448_s26, %s2024_s29  ;;  %p1581_p3 = por %p86_p2, %p59_p1 }
  0x1a   : > { %p40_p4 = scmp.ge.s32.totalorder %s2026_s30, 3  ;;  %p49_p5 = scmp.eq.s32.totalorder %s1577_s6, 0 }
  0x1b   : > { %p92_p6 = scmp.ne.s32.totalorder %s1420_s19, %s1416_s18  ;;  %p1096_p7 = scmp.lt.s32.totalorder %s1456_s28, 9 }
  0x1c   : > { %s2028_s30 = smov (%p40_p4, %s2026_s30), 0  ;;  %s229_s8 = sand.u32 1, %s1456_s28  }
  0x1d   : > { %1981 = sst [smem:[#allocation20_spill]] %s2028_s30  ;;  %s1594_s9 = ssub.s32 %s1452_s27, %s2028_s30 }
  0x1e   : > { %s76_s10 = sor.u32 %s1594_s9, %s1577_s6  ;;  %s231_s11 = sand.u32 1, %s1424_s20  }
  0x1f   : > { %p77_p8 = scmp.eq.s32.totalorder %s76_s10, 0  ;;  %s1041_s12 = sshll.u32 %s231_s11, 9 }
  0x20   : > { %s1042_s13 = sshll.u32 %s1452_s27, 6  ;;  %s1073_s29 = smul.u32 192, %s1448_s26 }
  0x21   : > { %s1601_s14 = scalar_select %p77_p8, %s1424_s20, %s79_s5  }
  0x22   : > { %s233_s4 = scalar_lea.vmem [#allocation6], %s1041_s12  ;;  %p1608_p9 = pnand %p1096_p7, %p1581_p3 }
  0x23   : > { %s242_s25 = sshll.u32 %s233_s4, 4  ;;  %s239_s30 = sadd.s32 %s1073_s29, %s1042_s13  ;;  %s243_s25 = int_to_ptr.vmem [resolvable:$true] %s242_s25 }
  0x24   : > { %s1043_s24 = sshll.u32 %s239_s30, 7  ;;  %s1983_s1 = sld [smem:[#allocation22_spill]] }
  0x25   : > { %s1615_s11 = scalar_lea.sflag [#allocation7], %s229_s8  ;;  %p1222_p10 = pneg %p1608_p9 }
  0x26   : > { %s1233_s5 = scalar_lea.vmem %s243_s25, 8192  ;;  %s1458_s4 = smov [#allocation6]  }
  0x27   : > { %p1234_p11 = scmp.ne.s32.totalorder %s243_s25, %s1233_s5  ;;  %s1238_s7 = sshll.u32 %s1458_s4, 4  ;;  %s1239_s7 = int_to_ptr.vmem [resolvable:$false] %s1238_s7 }
  0x28   : > { %s1240_s12 = scalar_lea.vmem %s1239_s7, 16384  ;;  %p1241_p0 = scmp.lt.s32.totalorder %s243_s25, %s1239_s7 }
  0x29   : > { %p1236_p12 = pnand %p1234_p11, %p1222_p10  ;;  %p1242_p2 = scmp.lt.s32.totalorder %s1240_s12, %s1233_s5 }
  0x2a   : > { %s241_s10 = scalar_lea.hbm %s1983_s1, %s1043_s24 }
  0x2b   : > { %p1237_p13 = pneg %p1236_p12  ;;  %p1243_p3 = por %p1242_p2, %p1241_p0 }
  0x2d   : > { %p1244_p4 = pnand %p1243_p3, %p1237_p13 }
  0x2f   : > { %1247 = shalt.err (!%p1244_p4)
}
  0x30   : > { %s1459_s29 = smov 256   ;;  %s1460_s2 = smov 16  }
  0x31   : > { %1088 = dma.hbm_to_vmem [thread:$0]  (!%p1608_p9), %s241_s10, 8192, %s243_s25, %s1615_s11, %s1459_s29, %s1459_s29, %s1460_s2  }
  0x32   : > { %p1047_p8 = scmp.ge.s32.totalorder %s1456_s28, 1  ;;  %p269_p10 = scmp.lt.s32.totalorder %s1456_s28, 10 }
  0x33   : > { %s51_s24 = sadd.s32 1, %s1436_s23  ;;  %p58_p12 = scmp.ne.s32.totalorder %s1436_s23, %s1432_s22 }
  0x34   : > { %p1624_p11 = pnand %p1047_p8, %p269_p10  ;;  %p64_p13 = scmp.ne.s32.totalorder %s1432_s22, %s1428_s21 }
  0x35   : > { %s1632_s30 = scalar_select %p49_p5, %s1436_s23, %s51_s24  }
  0x36   : > { %s205_s8 = sand.u32 1, %s1436_s23   ;;  %s1070_s13 = sshll.u32 %s1448_s26, 9 }
  0x37   : > { %p60_p0 = por %p59_p1, %p58_p12  ;;  %s1038_s5 = sshll.u32 %s205_s8, 6 }
  0x38   : > { %s1985_s0 = sld [smem:[#allocation21_spill]]  ;;  %s209_s6 = scalar_lea.vmem [#allocation3], %s1038_s5 }
  0x39   : > { %p1647_p9 = pnand %p1096_p7, %p60_p0  ;;  %s219_s7 = sshll.u32 %s209_s6, 4  ;;  %s220_s7 = int_to_ptr.vmem [resolvable:$true] %s219_s7 }
  0x3a   : > { %s206_s12 = scalar_lea.sflag [#allocation4], %s205_s8  ;;  %s1261_s29 = scalar_lea.vmem %s220_s7, 1024 }
  0x3b   : > { %p1250_p5 = pneg %p1647_p9  ;;  %p1262_p2 = scmp.ne.s32.totalorder %s220_s7, %s1261_s29 }
  0x3c   : > { %s1461_s2 = smov [#allocation3]  }
  0x3d   : > { %p1264_p3 = pnand %p1262_p2, %p1250_p5  ;;  %s1266_s24 = sshll.u32 %s1461_s2, 4  ;;  %s1267_s24 = int_to_ptr.vmem [resolvable:$false] %s1266_s24 }
  0x3e   : > { %s218_s25 = scalar_lea.hbm %s1985_s0, %s1070_s13  ;;  %s1268_s13 = scalar_lea.vmem %s1267_s24, 2048 }
  0x3f   : > { %p1265_p4 = pneg %p1264_p3  ;;  %p1269_p8 = scmp.lt.s32.totalorder %s220_s7, %s1267_s24 }
  0x40   : > { %p1270_p10 = scmp.lt.s32.totalorder %s1268_s13, %s1261_s29 }
  0x42   : > { %p1271_p12 = por %p1270_p10, %p1269_p8 }
  0x44   : > { %p1272_p0 = pnand %p1271_p12, %p1265_p4 }
  0x46   : > { %1275 = shalt.err (!%p1272_p0)
}
  0x47   : > { %s1462_s4 = smov 1536   ;;  %s1987_s8 = sld [smem:[#allocation14_spill]] }
  0x48   : > { %s1463_s5 = smov 512   ;;  %s1464_s3 = smov 32  }
  0x49   : > { %1085 = dma.hbm_to_vmem [thread:$0]  (!%p1647_p9), %s218_s25, 1024, %s220_s7, %s206_s12, %s1462_s4, %s1463_s5, %s1464_s3  }
  0x4a   : > { %s1656_s6 = sadd.s32 4294967295, %s1456_s28   ;;  %s1034_s29 = sadd.s32 4294967294, %s1456_s28  }
  0x4b   : > { %p65_p5 = scmp.eq.s32.totalorder %s1656_s6, 0  ;;  %p103_p2 = scmp.eq.s32.totalorder %s1594_s9, 0 }
  0x4c   : > { %s105_s2 = sadd.s32 1, %s1412_s17  ;;  %p112_p3 = scmp.ne.s32.totalorder %s1412_s17, %s1408_s16 }
  0x4d   : > { %p1667_p4 = por %p65_p5, %p64_p13  ;;  %p1674_p8 = por %p92_p6, %p65_p5 }
  0x4e   : > { %s1679_s25 = scalar_select %p103_p2, %s1412_s17, %s105_s2  }
  0x4f   : > { %p1683_p9 = por %p112_p3, %p59_p1  ;;  %p118_p10 = scmp.ne.s32.totalorder %s1408_s16, %s1987_s8 }
  0x50   : > { %p170_p12 = scmp.eq.s32.totalorder %s1656_s6, 8  ;;  %p176_p13 = scmp.eq.s32.totalorder %s1034_s29, 8 }
  0x51   : > { %p1690_p0 = por %p118_p10, %p65_p5  ;;  %s254_s18 = sand.u32 1, %s1412_s17  }
  0x52   : > { %p1695_p6 = por %p170_p12, %p112_p3  ;;  %p1699_p2 = por %p176_p13, %p118_p10 }
  0x53   : > { %s1991_s21 = scalar_select %p1690_p0, 1, 0 }
  0x54   : > { %s1992_s9 = scalar_select %p1695_p6, 1, 0 }
  0x55   : > { %s1993_s12 = scalar_select %p1699_p2, 1, 0 }
  0x56   : > { %s1044_s13 = sshll.u32 %s254_s18, 3  ;;  %s1071_s4 = sshll.u32 %s1452_s27, 7 }
  0x57   : > { %s1994_s8 = sld [smem:[#allocation23_spill]]  ;;  %s256_s29 = scalar_lea.vmem [#allocation8], %s1044_s13 }
  0x58   : > { %s264_s0 = sshll.u32 %s256_s29, 4  ;;  %p1711_p1 = pnand %p1096_p7, %p1683_p9  ;;  %s265_s0 = int_to_ptr.vmem [resolvable:$true] %s264_s0 }
  0x59   : > { %s1289_s26 = scalar_lea.vmem %s265_s0, 128  ;;  %s1465_s18 = smov [#allocation8]  }
  0x5a   : > { %p1278_p5 = pneg %p1711_p1  ;;  %p1290_p3 = scmp.ne.s32.totalorder %s265_s0, %s1289_s26 }
  0x5b   : > { %s1294_s27 = sshll.u32 %s1465_s18, 4  ;;  %s1295_s27 = int_to_ptr.vmem [resolvable:$false] %s1294_s27 }
  0x5c   : > { %p1292_p10 = pnand %p1290_p3, %p1278_p5  ;;  %p1297_p13 = scmp.lt.s32.totalorder %s265_s0, %s1295_s27 }
  0x5d   : > { %s262_s2 = scalar_lea.hbm %s1994_s8, %s1071_s4  ;;  %s1296_s4 = scalar_lea.vmem %s1295_s27, 256 }
  0x5e   : > { %p1293_p12 = pneg %p1292_p10  ;;  %p1298_p2 = scmp.lt.s32.totalorder %s1296_s4, %s1289_s26 }
  0x60   : > { %p1299_p6 = por %p1298_p2, %p1297_p13 }
  0x62   : > { %p1300_p0 = pnand %p1299_p6, %p1293_p12 }
  0x64   : > { %1303 = shalt.err (!%p1300_p0)
}
  0x65   : > { %1091 = dma.hbm_to_vmem [thread:$0]  (!%p1711_p1), %s262_s2, 128, %s265_s0, %s1615_s11  }
  0x66   : > { %273 = sbr.rel (%p1624_p11) target bundleno = 647 (0x287), region = 36  ;;  %s275_s7 = sand.u32 (!%p1624_p11), 1, %s1432_s22  }
  0x67   : > { %s1048_s13 = sshll.u32 (!%p1624_p11), %s275_s7, 6  ;;  %s276_s5 = scalar_lea.sflag (!%p1624_p11), [#allocation4], %s275_s7 }
  0x68   : > { %s1723_s3 = scalar_lea.vmem (!%p1624_p11), [#allocation3], %s1048_s13 }
  0x6b   : > { %1387 = dma.done.wait (%p1667_p4), %s276_s5, 1024  }
  0x6c   : > { %1389 = vsyncadd (%p1667_p4), %s276_s5, 4294966272  ;;  %s284_s1 = sand.u32 1, %s1656_s6   ;;  %s286_s0 = sand.u32 1, %s1420_s19  }
  0x6d   : > { %s1049_s26 = sshll.u32 %s286_s0, 9  ;;  %s285_s27 = scalar_lea.sflag [#allocation7], %s284_s1 }
  0x6e   : > { %s1731_s11 = scalar_lea.vmem [#allocation6], %s1049_s26 }
  0x6f   : > { %1391 = dma.done.wait (%p1674_p8), %s285_s27, 8192  }
  0x70   : > { %1393 = vsyncadd (%p1674_p8), %s285_s27, 4294959104  ;;  %s1738_s15 = sand.u32 1, %s1408_s16   ;;  %p1996_p7 = scmp.ne.s32.totalorder %s1991_s21, 0 }
  0x71   : > { %s1050_s24 = sshll.u32 %s1738_s15, 3 }
  0x72   : > { %s1741_s8 = scalar_lea.vmem [#allocation8], %s1050_s24 }
  0x73   : > { %1395 = dma.done.wait (%p1996_p7), %s285_s27, 128  }
  0x74   : > { %1397 = vsyncadd (%p1996_p7), %s285_s27, 4294967168  ;;  %s1051_s6 = sshll.u32 %s1738_s15, 5  ;;  %v363_v0 = vld [vmem:[%s1731_s11 + $0x38] sm:$0xff]  ;;  %v362_v2 = vld [vmem:[%s1731_s11 + $0x30] sm:$0xff]  ;;  %s1997_s21 = sld [smem:[#allocation15_spill]] }
  0x75   : > { %v379_v1 = vld [vmem:[%s1731_s11 + $0xb8] sm:$0xff]  ;;  %v433_v3 = vunpack.c.l.s8.bf16 %v363_v0  ;;  %v435_v4 = vunpack.c.h.s8.bf16 %v363_v0  ;;  %v378_v7 = vld [vmem:[%s1731_s11 + $0xb0] sm:$0xff]  ;;  %v434_v8 = vunpack.c.h.s8.bf16 %v362_v2  ;;  %v361_v10 = vld [vmem:[%s1731_s11 + $0x28] sm:$0xff]  ;;  %v432_v12 = vunpack.c.l.s8.bf16 %v362_v2  ;;  %s1854_s10 = scalar_lea.vmem [#allocation9], %s1051_s6 }
  0x76   : > { %v465_v5 = vunpack.c.l.s8.bf16 %v379_v1  ;;  %v467_v6 = vunpack.c.h.s8.bf16 %v379_v1  ;;  %v466_v9 = vunpack.c.h.s8.bf16 %v378_v7  ;;  %v377_v11 = vld [vmem:[%s1731_s11 + $0xa8] sm:$0xff]  ;;  %v464_v13 = vunpack.c.l.s8.bf16 %v378_v7  ;;  %v360_v16 = vld [vmem:[%s1731_s11 + $0x20] sm:$0xff]  ;;  %v359_v22 = vld [vmem:[%s1731_s11 + $0x18] sm:$0xff] }
  0x77   : > { %588 = vmatprep.subr.bf16.mxu0 %v435_v4  ;;  %v431_v14 = vunpack.c.h.s8.bf16 %v361_v10  ;;  %v463_v15 = vunpack.c.h.s8.bf16 %v377_v11  ;;  %v376_v17 = vld [vmem:[%s1731_s11 + $0xa0] sm:$0xff]  ;;  %v430_v18 = vunpack.c.h.s8.bf16 %v360_v16  ;;  %v429_v20 = vunpack.c.l.s8.bf16 %v361_v10  ;;  %v375_v23 = vld [vmem:[%s1731_s11 + $0x98] sm:$0xff]  ;;  %v358_v28 = vld [vmem:[%s1731_s11 + $0x10] sm:$0xff] }
  0x78   : > { %631 = vmatprep.subr.bf16.mxu1 %v467_v6  ;;  %589 = vmatpush1.bf16.msra.mxu0 %v434_v8  ;;  %v462_v19 = vunpack.c.h.s8.bf16 %v376_v17  ;;  %v461_v21 = vunpack.c.l.s8.bf16 %v377_v11  ;;  %v428_v24 = vunpack.c.l.s8.bf16 %v360_v16  ;;  %v460_v25 = vunpack.c.l.s8.bf16 %v376_v17  ;;  %v374_v29 = vld [vmem:[%s1731_s11 + $0x90] sm:$0xff]  ;;  %v1761_v30 = vld [vmem:[%s1723_s3] sm:$0xff]  ;;  %v1767_v32 = vld [vmem:[%s1723_s3 + $0x8] sm:$0xff] }
  0x79   : > { %632 = vmatpush1.bf16.msra.mxu1 %v466_v9  ;;  %590 = vmatprep.subr.bf16.mxu0 %v433_v3  ;;  %v427_v26 = vunpack.c.h.s8.bf16 %v359_v22  ;;  %v459_v27 = vunpack.c.h.s8.bf16 %v375_v23  ;;  %v1764_v31 = vld [vmem:[%s1723_s3 + $0x20] sm:$0xff]  ;;  %v1770_v33 = vld [vmem:[%s1723_s3 + $0x28] sm:$0xff]  ;;  %v426_v34 = vunpack.c.h.s8.bf16 %v358_v28  ;;  %v458_v35 = vunpack.c.h.s8.bf16 %v374_v29  ;;  %v371_v52 = vld [vmem:[%s1731_s11 + $0x78] sm:$0xff] }
  0x7a   : > { %633 = vmatprep.subr.bf16.mxu1 %v465_v5  ;;  %v425_v36 = vunpack.c.l.s8.bf16 %v359_v22  ;;  %v457_v37 = vunpack.c.l.s8.bf16 %v375_v23  ;;  %v1053_v38 = vcombine.high %v1761_v30, %v1764_v31  ;;  %v357_v39 = vld [vmem:[%s1731_s11 + $0x8] sm:$0xff]  ;;  %v1055_v41 = vcombine.high %v1767_v32, %v1770_v33  ;;  %v356_v46 = vld [vmem:[%s1731_s11] sm:$0xff]  ;;  %v387_v53 = vld [vmem:[%s1731_s11 + $0xf8] sm:$0xff]  ;;  %p1060_p11 = scmp.ne.s32.totalorder %s1997_s21, 0 }
  0x7b   : > { %v373_v40 = vld [vmem:[%s1731_s11 + $0x88] sm:$0xff]  ;;  %v424_v42 = vunpack.c.l.s8.bf16 %v358_v28  ;;  %v456_v43 = vunpack.c.l.s8.bf16 %v374_v29  ;;  %v423_v44 = vunpack.c.h.s8.bf16 %v357_v39  ;;  %v372_v47 = vld [vmem:[%s1731_s11 + $0x80] sm:$0xff]  ;;  %v422_v48 = vunpack.c.h.s8.bf16 %v356_v46  ;;  %v370_v58 = vld [vmem:[%s1731_s11 + $0x70] sm:$0xff] }
  0x7c   : > { %591 = vmatpush1.bf16.msra.mxu0 %v432_v12  ;;  %620 = vmatprep.mubr.bf16.mxu0 %v1053_v38  ;;  %v455_v45 = vunpack.c.h.s8.bf16 %v373_v40  ;;  %v454_v49 = vunpack.c.h.s8.bf16 %v372_v47  ;;  %v421_v50 = vunpack.c.l.s8.bf16 %v357_v39  ;;  %v453_v51 = vunpack.c.l.s8.bf16 %v373_v40  ;;  %v386_v59 = vld [vmem:[%s1731_s11 + $0xf0] sm:$0xff]  ;;  %v369_v0 = vld [vmem:[%s1731_s11 + $0x68] sm:$0xff]  ;;  %v368_v6 = vld [vmem:[%s1731_s11 + $0x60] sm:$0xff] }
  0x7d   : > { %634 = vmatpush1.bf16.msra.mxu1 %v464_v13  ;;  %592 = vmatprep.subr.bf16.mxu0 %v431_v14  ;;  %v420_v54 = vunpack.c.l.s8.bf16 %v356_v46  ;;  %v452_v55 = vunpack.c.l.s8.bf16 %v372_v47  ;;  %v451_v56 = vunpack.c.h.s8.bf16 %v371_v52  ;;  %v483_v57 = vunpack.c.h.s8.bf16 %v387_v53  ;;  %v385_v1 = vld [vmem:[%s1731_s11 + $0xe8] sm:$0xff]  ;;  %v384_v7 = vld [vmem:[%s1731_s11 + $0xe0] sm:$0xff]  ;;  %v367_v12 = vld [vmem:[%s1731_s11 + $0x58] sm:$0xff] }
  0x7e   : > { %635 = vmatprep.subr.bf16.mxu1 %v463_v15  ;;  %663 = vmatprep.mubr.bf16.mxu1 %v1055_v41  ;;  %v450_v60 = vunpack.c.h.s8.bf16 %v370_v58  ;;  %v482_v61 = vunpack.c.h.s8.bf16 %v386_v59  ;;  %v449_v62 = vunpack.c.l.s8.bf16 %v371_v52  ;;  %v481_v63 = vunpack.c.l.s8.bf16 %v387_v53  ;;  %v383_v13 = vld [vmem:[%s1731_s11 + $0xd8] sm:$0xff]  ;;  %v394_v46 = vld [vmem:[%s1731_s11 + $0x130] sm:$0xff] }
  0x7f   : > { %v448_v2 = vunpack.c.l.s8.bf16 %v370_v58  ;;  %v480_v3 = vunpack.c.l.s8.bf16 %v386_v59  ;;  %v447_v4 = vunpack.c.h.s8.bf16 %v369_v0  ;;  %v479_v5 = vunpack.c.h.s8.bf16 %v385_v1  ;;  %v395_v40 = vld [vmem:[%s1731_s11 + $0x138] sm:$0xff]  ;;  %v410_v47 = vld [vmem:[%s1731_s11 + $0x1b0] sm:$0xff] }
  0x80   : > { %593 = vmatpush1.bf16.msra.mxu0 %v430_v18  ;;  %v446_v8 = vunpack.c.h.s8.bf16 %v368_v6  ;;  %v478_v9 = vunpack.c.h.s8.bf16 %v384_v7  ;;  %v445_v10 = vunpack.c.l.s8.bf16 %v369_v0  ;;  %v477_v11 = vunpack.c.l.s8.bf16 %v385_v1  ;;  %v366_v18 = vld [vmem:[%s1731_s11 + $0x50] sm:$0xff]  ;;  %v411_v41 = vld [vmem:[%s1731_s11 + $0x1b8] sm:$0xff] }
  0x81   : > { %636 = vmatpush1.bf16.msra.mxu1 %v462_v19  ;;  %594 = vmatprep.subr.bf16.mxu0 %v429_v20  ;;  %v444_v14 = vunpack.c.l.s8.bf16 %v368_v6  ;;  %v476_v15 = vunpack.c.l.s8.bf16 %v384_v7  ;;  %v443_v16 = vunpack.c.h.s8.bf16 %v367_v12  ;;  %v475_v17 = vunpack.c.h.s8.bf16 %v383_v13  ;;  %v382_v19 = vld [vmem:[%s1731_s11 + $0xd0] sm:$0xff]  ;;  %v1811_v52 = vld [vmem:[%s1723_s3 + $0x18] sm:$0xff] }
  0x82   : > { %637 = vmatprep.subr.bf16.mxu1 %v461_v21  ;;  %v442_v20 = vunpack.c.h.s8.bf16 %v366_v18  ;;  %v474_v21 = vunpack.c.h.s8.bf16 %v382_v19  ;;  %v441_v22 = vunpack.c.l.s8.bf16 %v367_v12  ;;  %v473_v23 = vunpack.c.l.s8.bf16 %v383_v13  ;;  %v1814_v53 = vld [vmem:[%s1723_s3 + $0x38] sm:$0xff] }
  0x83   : > { %v496_v58 = vunpack.c.l.s8.bf16 %v394_v46  ;;  %v528_v59 = vunpack.c.l.s8.bf16 %v410_v47 }
  0x84   : > { %595 = vmatpush1.bf16.msra.mxu0 %v428_v24  ;;  %v365_v24 = vld [vmem:[%s1731_s11 + $0x48] sm:$0xff] }
  0x85   : > { %638 = vmatpush1.bf16.msra.mxu1 %v460_v25  ;;  %596 = vmatprep.subr.bf16.mxu0 %v427_v26  ;;  %v381_v25 = vld [vmem:[%s1731_s11 + $0xc8] sm:$0xff]  ;;  %v440_v26 = vunpack.c.l.s8.bf16 %v366_v18  ;;  %v439_v28 = vunpack.c.h.s8.bf16 %v365_v24  ;;  %v437_v38 = vunpack.c.l.s8.bf16 %v365_v24 }
  0x86   : > { %639 = vmatprep.subr.bf16.mxu1 %v459_v27  ;;  %v472_v27 = vunpack.c.l.s8.bf16 %v382_v19  ;;  %v471_v29 = vunpack.c.h.s8.bf16 %v381_v25  ;;  %v469_v39 = vunpack.c.l.s8.bf16 %v381_v25 }
  0x88   : > { %597 = vmatpush1.bf16.msra.mxu0 %v426_v34  ;;  %v364_v34 = vld [vmem:[%s1731_s11 + $0x40] sm:$0xff] }
  0x89   : > { %640 = vmatpush1.bf16.msra.mxu1 %v458_v35  ;;  %598 = vmatprep.subr.bf16.mxu0 %v425_v36  ;;  %v380_v35 = vld [vmem:[%s1731_s11 + $0xc0] sm:$0xff]  ;;  %v438_v36 = vunpack.c.h.s8.bf16 %v364_v34 }
  0x8a   : > { %641 = vmatprep.subr.bf16.mxu1 %v457_v37  ;;  %v470_v37 = vunpack.c.h.s8.bf16 %v380_v35 }
  0x8c   : > { %599 = vmatpush1.bf16.msra.mxu0 %v424_v42  ;;  %v436_v42 = vunpack.c.l.s8.bf16 %v364_v34 }
  0x8d   : > { %642 = vmatpush1.bf16.msra.mxu1 %v456_v43  ;;  %600 = vmatprep.subr.bf16.mxu0 %v423_v44  ;;  %v468_v43 = vunpack.c.l.s8.bf16 %v380_v35  ;;  %v499_v44 = vunpack.c.h.s8.bf16 %v395_v40 }
  0x8e   : > { %643 = vmatprep.subr.bf16.mxu1 %v455_v45  ;;  %v531_v45 = vunpack.c.h.s8.bf16 %v411_v41 }
  0x90   : > { %601 = vmatpush1.bf16.msra.mxu0 %v422_v48  ;;  %v1801_v48 = vld [vmem:[%s1723_s3 + $0x10] sm:$0xff] }
  0x91   : > { %644 = vmatpush1.bf16.msra.mxu1 %v454_v49  ;;  %602 = vmatprep.subr.bf16.mxu0 %v421_v50  ;;  %v1052_v49 = vcombine.low %v1761_v30, %v1764_v31  ;;  %v1054_v50 = vcombine.low %v1767_v32, %v1770_v33  ;;  %v393_v30 = vld [vmem:[%s1731_s11 + $0x128] sm:$0xff]  ;;  %v1059_v33 = vcombine.high %v1811_v52, %v1814_v53 }
  0x92   : > { %645 = vmatprep.subr.bf16.mxu1 %v453_v51  ;;  %v1808_v51 = vld [vmem:[%s1723_s3 + $0x30] sm:$0xff]  ;;  %v409_v31 = vld [vmem:[%s1731_s11 + $0x1a8] sm:$0xff] }
  0x93   : > { %v1057_v32 = vcombine.high %v1801_v48, %v1808_v51 }
  0x94   : > { %603 = vmatpush1.bf16.msra.mxu0 %v420_v54  ;;  %v498_v54 = vunpack.c.h.s8.bf16 %v394_v46 }
  0x95   : > { %646 = vmatpush1.bf16.msra.mxu1 %v452_v55  ;;  %604 = vmatprep.subr.bf16.mxu0 %v451_v56  ;;  %v530_v55 = vunpack.c.h.s8.bf16 %v410_v47  ;;  %v497_v56 = vunpack.c.l.s8.bf16 %v395_v40 }
  0x96   : > { %647 = vmatprep.subr.bf16.mxu1 %v483_v57  ;;  %v529_v57 = vunpack.c.l.s8.bf16 %v411_v41 }
  0x98   : > { %605 = vmatpush2.bf16.msra.mxu0 %v450_v60  ;;  %v495_v60 = vunpack.c.h.s8.bf16 %v393_v30 }
  0x99   : > { %648 = vmatpush2.bf16.msra.mxu1 %v482_v61  ;;  %606 = vmatprep.subr.bf16.mxu0 %v449_v62  ;;  %v527_v61 = vunpack.c.h.s8.bf16 %v409_v31  ;;  %v392_v62 = vld [vmem:[%s1731_s11 + $0x120] sm:$0xff] }
  0x9a   : > { %649 = vmatprep.subr.bf16.mxu1 %v481_v63  ;;  %v408_v63 = vld [vmem:[%s1731_s11 + $0x1a0] sm:$0xff]  ;;  %v494_v0 = vunpack.c.h.s8.bf16 %v392_v62  ;;  %v492_v6 = vunpack.c.l.s8.bf16 %v392_v62  ;;  %v398_v62 = vld [vmem:[%s1731_s11 + $0x150] sm:$0xff] }
  0x9b   : > { %v526_v1 = vunpack.c.h.s8.bf16 %v408_v63  ;;  %v524_v7 = vunpack.c.l.s8.bf16 %v408_v63  ;;  %v414_v63 = vld [vmem:[%s1731_s11 + $0x1d0] sm:$0xff] }
  0x9c   : > { %607 = vmatpush2.bf16.msra.mxu0 %v448_v2  ;;  %v493_v2 = vunpack.c.l.s8.bf16 %v393_v30 }
  0x9d   : > { %650 = vmatpush2.bf16.msra.mxu1 %v480_v3  ;;  %608 = vmatprep.subr.bf16.mxu0 %v447_v4  ;;  %v525_v3 = vunpack.c.l.s8.bf16 %v409_v31  ;;  %v391_v4 = vld [vmem:[%s1731_s11 + $0x118] sm:$0xff] }
  0x9e   : > { %651 = vmatprep.subr.bf16.mxu1 %v479_v5  ;;  %v407_v5 = vld [vmem:[%s1731_s11 + $0x198] sm:$0xff] }
  0xa0   : > { %609 = vmatpush2.bf16.msra.mxu0 %v446_v8  ;;  %v491_v8 = vunpack.c.h.s8.bf16 %v391_v4 }
  0xa1   : > { %652 = vmatpush2.bf16.msra.mxu1 %v478_v9  ;;  %610 = vmatprep.subr.bf16.mxu0 %v445_v10  ;;  %v523_v9 = vunpack.c.h.s8.bf16 %v407_v5  ;;  %v390_v10 = vld [vmem:[%s1731_s11 + $0x110] sm:$0xff] }
  0xa2   : > { %653 = vmatprep.subr.bf16.mxu1 %v477_v11  ;;  %v406_v11 = vld [vmem:[%s1731_s11 + $0x190] sm:$0xff]  ;;  %v490_v12 = vunpack.c.h.s8.bf16 %v390_v10  ;;  %v488_v18 = vunpack.c.l.s8.bf16 %v390_v10  ;;  %v396_v10 = vld [vmem:[%s1731_s11 + $0x140] sm:$0xff] }
  0xa3   : > { %v522_v13 = vunpack.c.h.s8.bf16 %v406_v11  ;;  %v520_v19 = vunpack.c.l.s8.bf16 %v406_v11  ;;  %v412_v11 = vld [vmem:[%s1731_s11 + $0x1c0] sm:$0xff] }
  0xa4   : > { %611 = vmatpush2.bf16.msra.mxu0 %v444_v14  ;;  %v489_v14 = vunpack.c.l.s8.bf16 %v391_v4  ;;  %v397_v4 = vld [vmem:[%s1731_s11 + $0x148] sm:$0xff] }
  0xa5   : > { %654 = vmatpush2.bf16.msra.mxu1 %v476_v15  ;;  %612 = vmatprep.subr.bf16.mxu0 %v443_v16  ;;  %v521_v15 = vunpack.c.l.s8.bf16 %v407_v5  ;;  %v389_v16 = vld [vmem:[%s1731_s11 + $0x108] sm:$0xff] }
  0xa6   : > { %655 = vmatprep.subr.bf16.mxu1 %v475_v17  ;;  %v405_v17 = vld [vmem:[%s1731_s11 + $0x188] sm:$0xff] }
  0xa7   : > { %v413_v5 = vld [vmem:[%s1731_s11 + $0x1c8] sm:$0xff] }
  0xa8   : > { %613 = vmatpush2.bf16.msra.mxu0 %v442_v20  ;;  %v487_v20 = vunpack.c.h.s8.bf16 %v389_v16 }
  0xa9   : > { %656 = vmatpush2.bf16.msra.mxu1 %v474_v21  ;;  %614 = vmatprep.subr.bf16.mxu0 %v441_v22  ;;  %v519_v21 = vunpack.c.h.s8.bf16 %v405_v17  ;;  %v388_v22 = vld [vmem:[%s1731_s11 + $0x100] sm:$0xff] }
  0xaa   : > { %657 = vmatprep.subr.bf16.mxu1 %v473_v23  ;;  %v404_v23 = vld [vmem:[%s1731_s11 + $0x180] sm:$0xff]  ;;  %v486_v24 = vunpack.c.h.s8.bf16 %v388_v22  ;;  %v484_v34 = vunpack.c.l.s8.bf16 %v388_v22 }
  0xab   : > { %v518_v25 = vunpack.c.h.s8.bf16 %v404_v23  ;;  %v516_v35 = vunpack.c.l.s8.bf16 %v404_v23 }
  0xac   : > { %615 = vmatpush2.bf16.msra.mxu0 %v440_v26  ;;  %v485_v26 = vunpack.c.l.s8.bf16 %v389_v16  ;;  %v500_v16 = vunpack.c.l.s8.bf16 %v396_v10 }
  0xad   : > { %658 = vmatpush2.bf16.msra.mxu1 %v472_v27  ;;  %616 = vmatprep.subr.bf16.mxu0 %v439_v28  ;;  %v517_v27 = vunpack.c.l.s8.bf16 %v405_v17  ;;  %v403_v28 = vld [vmem:[%s1731_s11 + $0x178] sm:$0xff]  ;;  %v532_v17 = vunpack.c.l.s8.bf16 %v412_v11 }
  0xae   : > { %659 = vmatprep.subr.bf16.mxu1 %v471_v29  ;;  %v419_v29 = vld [vmem:[%s1731_s11 + $0x1f8] sm:$0xff] }
  0xb0   : > { %617 = vmatpush2.bf16.msra.mxu0 %v438_v36  ;;  %v515_v36 = vunpack.c.h.s8.bf16 %v403_v28 }
  0xb1   : > { %660 = vmatpush2.bf16.msra.mxu1 %v470_v37  ;;  %618 = vmatprep.subr.bf16.mxu0 %v437_v38  ;;  %v547_v37 = vunpack.c.h.s8.bf16 %v419_v29  ;;  %v402_v38 = vld [vmem:[%s1731_s11 + $0x170] sm:$0xff] }
  0xb2   : > { %661 = vmatprep.subr.bf16.mxu1 %v469_v39  ;;  %v418_v39 = vld [vmem:[%s1731_s11 + $0x1f0] sm:$0xff]  ;;  %v514_v40 = vunpack.c.h.s8.bf16 %v402_v38  ;;  %v512_v46 = vunpack.c.l.s8.bf16 %v402_v38 }
  0xb3   : > { %v546_v41 = vunpack.c.h.s8.bf16 %v418_v39  ;;  %v544_v47 = vunpack.c.l.s8.bf16 %v418_v39 }
  0xb4   : > { %619 = vmatpush2.bf16.msra.mxu0 %v436_v42  ;;  %v513_v42 = vunpack.c.l.s8.bf16 %v403_v28 }
  0xb5   : > { %662 = vmatpush2.bf16.msra.mxu1 %v468_v43  ;;  %674 = vmatprep.subr.bf16.mxu0 %v499_v44  ;;  %v545_v43 = vunpack.c.l.s8.bf16 %v419_v29  ;;  %v401_v44 = vld [vmem:[%s1731_s11 + $0x168] sm:$0xff] }
  0xb6   : > { %717 = vmatprep.subr.bf16.mxu1 %v531_v45  ;;  %v417_v45 = vld [vmem:[%s1731_s11 + $0x1e8] sm:$0xff]  ;;  %v509_v30 = vunpack.c.l.s8.bf16 %v401_v44 }
  0xb7   : > { %621 = vmatmul.mubr.bf16.vlgmr.msra.gmra.mxu0 %v1052_v49  ;;  %v511_v49 = vunpack.c.h.s8.bf16 %v401_v44  ;;  %v541_v31 = vunpack.c.l.s8.bf16 %v417_v45 }
  0xb8   : > { %664 = vmatmul.mubr.bf16.vlgmr.msra.gmra.mxu1 %v1054_v50  ;;  %675 = vmatpush1.bf16.msra.mxu0 %v498_v54  ;;  %v543_v50 = vunpack.c.h.s8.bf16 %v417_v45  ;;  %v400_v54 = vld [vmem:[%s1731_s11 + $0x160] sm:$0xff] }
  0xb9   : > { %718 = vmatpush1.bf16.msra.mxu1 %v530_v55  ;;  %676 = vmatprep.subr.bf16.mxu0 %v497_v56  ;;  %v416_v55 = vld [vmem:[%s1731_s11 + $0x1e0] sm:$0xff]  ;;  %v510_v56 = vunpack.c.h.s8.bf16 %v400_v54 }
  0xba   : > { %719 = vmatprep.subr.bf16.mxu1 %v529_v57  ;;  %706 = vmatprep.mubr.bf16.mxu0 %v1057_v32  ;;  %v542_v57 = vunpack.c.h.s8.bf16 %v416_v55  ;;  %v399_v32 = vld [vmem:[%s1731_s11 + $0x158] sm:$0xff] }
  0xbb   : > { %749 = vmatprep.mubr.bf16.mxu1 %v1059_v33  ;;  %v415_v33 = vld [vmem:[%s1731_s11 + $0x1d8] sm:$0xff] }
  0xbc   : > { %677 = vmatpush1.bf16.msra.mxu0 %v496_v58  ;;  %v508_v58 = vunpack.c.l.s8.bf16 %v400_v54 }
  0xbd   : > { %720 = vmatpush1.bf16.msra.mxu1 %v528_v59  ;;  %678 = vmatprep.subr.bf16.mxu0 %v495_v60  ;;  %v540_v59 = vunpack.c.l.s8.bf16 %v416_v55  ;;  %v507_v60 = vunpack.c.h.s8.bf16 %v399_v32 }
  0xbe   : > { %721 = vmatprep.subr.bf16.mxu1 %v527_v61  ;;  %v539_v61 = vunpack.c.h.s8.bf16 %v415_v33 }
  0xc0   : > { %679 = vmatpush1.bf16.msra.mxu0 %v494_v0  ;;  %v506_v0 = vunpack.c.h.s8.bf16 %v398_v62 }
  0xc1   : > { %722 = vmatpush1.bf16.msra.mxu1 %v526_v1  ;;  %680 = vmatprep.subr.bf16.mxu0 %v493_v2  ;;  %v538_v1 = vunpack.c.h.s8.bf16 %v414_v63  ;;  %v505_v2 = vunpack.c.l.s8.bf16 %v399_v32 }
  0xc2   : > { %723 = vmatprep.subr.bf16.mxu1 %v525_v3  ;;  %v537_v3 = vunpack.c.l.s8.bf16 %v415_v33 }
  0xc4   : > { %681 = vmatpush1.bf16.msra.mxu0 %v492_v6  ;;  %v504_v6 = vunpack.c.l.s8.bf16 %v398_v62 }
  0xc5   : > { %724 = vmatpush1.bf16.msra.mxu1 %v524_v7  ;;  %682 = vmatprep.subr.bf16.mxu0 %v491_v8  ;;  %v536_v7 = vunpack.c.l.s8.bf16 %v414_v63  ;;  %v503_v8 = vunpack.c.h.s8.bf16 %v397_v4 }
  0xc6   : > { %725 = vmatprep.subr.bf16.mxu1 %v523_v9  ;;  %v535_v9 = vunpack.c.h.s8.bf16 %v413_v5 }
  0xc8   : > { %683 = vmatpush1.bf16.msra.mxu0 %v490_v12  ;;  %v502_v12 = vunpack.c.h.s8.bf16 %v396_v10 }
  0xc9   : > { %726 = vmatpush1.bf16.msra.mxu1 %v522_v13  ;;  %684 = vmatprep.subr.bf16.mxu0 %v489_v14  ;;  %v534_v13 = vunpack.c.h.s8.bf16 %v412_v11  ;;  %v501_v14 = vunpack.c.l.s8.bf16 %v397_v4 }
  0xca   : > { %727 = vmatprep.subr.bf16.mxu1 %v521_v15  ;;  %v533_v15 = vunpack.c.l.s8.bf16 %v413_v5 }
  0xcc   : > { %685 = vmatpush1.bf16.msra.mxu0 %v488_v18  ;;  %v1056_v18 = vcombine.low %v1801_v48, %v1808_v51 }
  0xcd   : > { %728 = vmatpush1.bf16.msra.mxu1 %v520_v19  ;;  %686 = vmatprep.subr.bf16.mxu0 %v487_v20  ;;  %v1058_v19 = vcombine.low %v1811_v52, %v1814_v53 }
  0xce   : > { %729 = vmatprep.subr.bf16.mxu1 %v519_v21 }
  0xd0   : > { %687 = vmatpush1.bf16.msra.mxu0 %v486_v24 }
  0xd1   : > { %730 = vmatpush1.bf16.msra.mxu1 %v518_v25  ;;  %688 = vmatprep.subr.bf16.mxu0 %v485_v26 }
  0xd2   : > { %731 = vmatprep.subr.bf16.mxu1 %v517_v27 }
  0xd4   : > { %689 = vmatpush1.bf16.msra.mxu0 %v484_v34 }
  0xd5   : > { %732 = vmatpush1.bf16.msra.mxu1 %v516_v35  ;;  %690 = vmatprep.subr.bf16.mxu0 %v515_v36 }
  0xd6   : > { %733 = vmatprep.subr.bf16.mxu1 %v547_v37 }
  0xd8   : > { %691 = vmatpush2.bf16.msra.mxu0 %v514_v40 }
  0xd9   : > { %734 = vmatpush2.bf16.msra.mxu1 %v546_v41  ;;  %692 = vmatprep.subr.bf16.mxu0 %v513_v42 }
  0xda   : > { %735 = vmatprep.subr.bf16.mxu1 %v545_v43 }
  0xdc   : > { %693 = vmatpush2.bf16.msra.mxu0 %v512_v46 }
  0xdd   : > { %736 = vmatpush2.bf16.msra.mxu1 %v544_v47  ;;  %694 = vmatprep.subr.bf16.mxu0 %v511_v49 }
  0xde   : > { %737 = vmatprep.subr.bf16.mxu1 %v543_v50 }
  0xe0   : > { %695 = vmatpush2.bf16.msra.mxu0 %v510_v56 }
  0xe1   : > { %738 = vmatpush2.bf16.msra.mxu1 %v542_v57  ;;  %696 = vmatprep.subr.bf16.mxu0 %v509_v30 }
  0xe2   : > { %739 = vmatprep.subr.bf16.mxu1 %v541_v31 }
  0xe4   : > { %697 = vmatpush2.bf16.msra.mxu0 %v508_v58 }
  0xe5   : > { %740 = vmatpush2.bf16.msra.mxu1 %v540_v59  ;;  %698 = vmatprep.subr.bf16.mxu0 %v507_v60 }
  0xe6   : > { %741 = vmatprep.subr.bf16.mxu1 %v539_v61 }
  0xe8   : > { %699 = vmatpush2.bf16.msra.mxu0 %v506_v0 }
  0xe9   : > { %742 = vmatpush2.bf16.msra.mxu1 %v538_v1  ;;  %700 = vmatprep.subr.bf16.mxu0 %v505_v2 }
  0xea   : > { %743 = vmatprep.subr.bf16.mxu1 %v537_v3 }
  0xec   : > { %701 = vmatpush2.bf16.msra.mxu0 %v504_v6 }
  0xed   : > { %744 = vmatpush2.bf16.msra.mxu1 %v536_v7  ;;  %702 = vmatprep.subr.bf16.mxu0 %v503_v8 }
  0xee   : > { %745 = vmatprep.subr.bf16.mxu1 %v535_v9 }
  0xf0   : > { %703 = vmatpush2.bf16.msra.mxu0 %v502_v12 }
  0xf1   : > { %746 = vmatpush2.bf16.msra.mxu1 %v534_v13  ;;  %704 = vmatprep.subr.bf16.mxu0 %v501_v14 }
  0xf2   : > { %747 = vmatprep.subr.bf16.mxu1 %v533_v15 }
  0xf4   : > { %705 = vmatpush2.bf16.msra.mxu0 %v500_v16 }
  0xf5   : > { %748 = vmatpush2.bf16.msra.mxu1 %v532_v17 }
  0xf7   : > { %707 = vmatmul.mubr.bf16.vlgmr.msra.gmra.mxu0 %v1056_v18 }
  0xf8   : > { %750 = vmatmul.mubr.bf16.vlgmr.msra.gmra.mxu1 %v1058_v19 }
 0x177   : > { %v622_v20 = vpop.f32.mrf.mxu0 }
 0x178   : > { %v665_v21 = vpop.f32.mrf.mxu1 }
 0x179   : > { %v624_v22 = vpop.f32.mrf.mxu0  ;;  %v666_v28 = vadd.f32 %v665_v21, %v622_v20 }
 0x17a   : > { %v667_v23 = vpop.f32.mrf.mxu1 }
 0x17b   : > { %v626_v24 = vpop.f32.mrf.mxu0  ;;  %v668_v35 = vadd.f32 %v667_v23, %v624_v22 }
 0x17c   : > { %v669_v25 = vpop.f32.mrf.mxu1 }
 0x17d   : > { %v628_v26 = vpop.f32.mrf.mxu0  ;;  %v670_v53 = vadd.f32 %v669_v25, %v626_v24 }
 0x17e   : > { %v671_v27 = vpop.f32.mrf.mxu1 }
 0x17f   : > { %v672_v40 = vadd.f32 %v671_v27, %v628_v26 }
 0x1b7   : > { %v708_v29 = vpop.f32.mrf.mxu0 }
 0x1b8   : > { %v751_v34 = vpop.f32.mrf.mxu1  ;;  %v709_v48 = vadd.f32 %v708_v29, %v666_v28 }
 0x1b9   : > { %v710_v51 = vpop.f32.mrf.mxu0 }
 0x1ba   : > { %v753_v52 = vpop.f32.mrf.mxu1  ;;  %v752_v36 = vadd.f32 %v751_v34, %v709_v48  ;;  %v711_v37 = vadd.f32 %v710_v51, %v668_v35 }
 0x1bb   : > { %v712_v38 = vpop.f32.mrf.mxu0 }
 0x1bc   : > { %v755_v39 = vpop.f32.mrf.mxu1  ;;  %v754_v41 = vadd.f32 %v753_v52, %v711_v37  ;;  %v713_v42 = vadd.f32 %v712_v38, %v670_v53  ;;  %763 = sbr.rel (%p1060_p11) target bundleno = 451 (0x1c3), region = 52 }
 0x1bd   : > { %v714_v43 = vpop.f32.mrf.mxu0 }
 0x1be   : > { %v756_v44 = vadd.f32 %v755_v39, %v713_v42  ;;  %v715_v45 = vadd.f32 %v714_v43, %v672_v40  ;;  %v757_v46 = vpop.f32.mrf.mxu1 }
 0x1c0   : > { %v758_v47 = vadd.f32 %v757_v46, %v715_v45 }
 0x1c1   : > { %764 = vst [vmem:[#allocation2 + $0x10] sm:$0xff] %v752_v36  ;;  %765 = vst [vmem:[#allocation2] sm:$0xff] %v754_v41 }
 0x1c2   : > { %766 = vst [vmem:[#allocation2 + $0x18] sm:$0xff] %v756_v44  ;;  %767 = vst [vmem:[#allocation2 + $0x8] sm:$0xff] %v758_v47 }
 0x1c3 PF: > { %s1998_s2 = sld [smem:[#allocation15_spill]] }
 0x1c9   : > { %p1061_p4 = scmp.le.s32.totalorder %s1998_s2, 0 }
 0x1cb   : > { %771 = sbr.rel (%p1061_p4) target bundleno = 469 (0x1d5), region = 56 }
 0x1d0   : > { %v772_v49 = vld [vmem:[#allocation2 + $0x10] sm:$0xff]  ;;  %v773_v50 = vld [vmem:[#allocation2] sm:$0xff]  ;;  %v774_v54 = vld [vmem:[#allocation2 + $0x18] sm:$0xff] }
 0x1d1   : > { %v776_v55 = vadd.f32 %v772_v49, %v752_v36  ;;  %v777_v56 = vadd.f32 %v773_v50, %v754_v41  ;;  %v778_v57 = vadd.f32 %v774_v54, %v756_v44  ;;  %v775_v30 = vld [vmem:[#allocation2 + $0x8] sm:$0xff] }
 0x1d2   : > { %v779_v31 = vadd.f32 %v775_v30, %v758_v47 }
 0x1d3   : > { %780 = vst [vmem:[#allocation2 + $0x10] sm:$0xff] %v776_v55  ;;  %781 = vst [vmem:[#allocation2] sm:$0xff] %v777_v56 }
 0x1d4   : > { %782 = vst [vmem:[#allocation2 + $0x18] sm:$0xff] %v778_v57  ;;  %783 = vst [vmem:[#allocation2 + $0x8] sm:$0xff] %v779_v31 }
 0x1d5 PF: > { %s1999_s29 = sld [smem:[#allocation15_spill]] }
 0x1db   : > { %p1062_p8 = scmp.ne.s32.totalorder %s1999_s29, 2 }
 0x1dc   : > { %s2000_s7 = sld [smem:[#allocation24_spill]] (!%p1062_p8) }
 0x1dd   : > { %787 = sbr.rel (%p1062_p8) target bundleno = 619 (0x26b), region = 60 }
 0x1e2   : > { %v810_v32 = vld [vmem:[%s2000_s7] sm:$0xff]  ;;  %v1466_v33 = vmov 0   ;;  %v811_v58 = vld [vmem:[%s2000_s7 + $0x8] sm:$0xff]  ;;  %v796_v59 = vlaneseq  ;;  %v791_v3 = vld [vmem:[#allocation2 + $0x10] sm:$0xff] }
 0x1e3   : > { %1219 = vset.pattern.permute.xlu0 %v1466_v33  ;;  %v788_v63 = vld [vmem:[%s1741_s8] ss:$4 sm:$0x3]  ;;  %v1063_v0 = vld [vmem:[%s1741_s8 + $0x1] ss:$4 sm:$0x3] }
 0x1e4   : > { %814 = vperm.xlu0 %1219, %v810_v32   ;;  %v797_v60 = vshrl.u32 %v796_v59, 7  ;;  %v792_v4 = vld [vmem:[#allocation2] sm:$0xff]  ;;  %v793_v11 = vld [vmem:[#allocation2 + $0x18] sm:$0xff]  ;;  %v794_v12 = vld [vmem:[#allocation2 + $0x8] sm:$0xff] }
 0x1e5   : > { %v1064_v7 = vld [vmem:[%s1741_s8 + $0x2] ss:$4 sm:$0x3] }
 0x1e6   : > { %v798_v61 = vsub.s32 0, %v797_v60  ;;  %v802_v62 = vsub.s32 1, %v797_v60 }
 0x1e8   : > { %819 = vperm.xlu0 %1219, %v811_v58   ;;  %v799_v1 = vrot.slane %v788_v63, %v798_v61  ;;  %v803_v2 = vrot.slane %v788_v63, %v802_v62  ;;  %v826_v5 = vrot.slane %v1063_v0, %v798_v61  ;;  %v830_v6 = vrot.slane %v1063_v0, %v802_v62 }
 0x1e9   : > { %v847_v15 = vrot.slane %v1064_v7, %v798_v61  ;;  %v851_v16 = vrot.slane %v1064_v7, %v802_v62 }
 0x1ea   : > { %v806_v8 = vmul.f32 %v799_v1, %v791_v3  ;;  %v807_v9 = vmul.f32 %v803_v2, %v792_v4  ;;  %v808_v19 = vmul.f32 %v799_v1, %v793_v11  ;;  %v809_v20 = vmul.f32 %v803_v2, %v794_v12 }
 0x25f   : > { %v815_v10 = vpop.permute.xlu0 %814 }
 0x260   : > { %v833_v13 = vmul.f32 %v826_v5, %v815_v10  ;;  %v834_v14 = vmul.f32 %v830_v6, %v815_v10 }
 0x262   : > { %v837_v17 = vsub.f32 %v806_v8, %v833_v13  ;;  %v838_v18 = vsub.f32 %v807_v9, %v834_v14 }
 0x263   : > { %v820_v21 = vpop.permute.xlu0 %819 }
 0x264   : > { %v854_v22 = vadd.f32 %v847_v15, %v837_v17  ;;  %v855_v23 = vadd.f32 %v851_v16, %v838_v18  ;;  %v835_v24 = vmul.f32 %v826_v5, %v820_v21  ;;  %v836_v25 = vmul.f32 %v830_v6, %v820_v21 }
 0x266   : > { %858 = vst [vmem:[%s1854_s10] sm:$0xff] %v854_v22  ;;  %859 = vst [vmem:[%s1854_s10 + $0x8] sm:$0xff] %v855_v23  ;;  %v839_v26 = vsub.f32 %v808_v19, %v835_v24  ;;  %v840_v27 = vsub.f32 %v809_v20, %v836_v25 }
 0x268   : > { %v856_v28 = vadd.f32 %v847_v15, %v839_v26  ;;  %v857_v29 = vadd.f32 %v851_v16, %v840_v27 }
 0x26a   : > { %860 = vst [vmem:[%s1854_s10 + $0x10] sm:$0xff] %v856_v28  ;;  %861 = vst [vmem:[%s1854_s10 + $0x18] sm:$0xff] %v857_v29 }
 0x26b PF: > { %s2001_s3 = sld [smem:[#allocation16_spill]]  ;;  %s879_s8 = sshll.u32 %s1854_s10, 4  ;;  %s1879_s8 = int_to_ptr.vmem [resolvable:$true] %s879_s8 }
 0x26c   : > { %s2002_s27 = sld [smem:[#allocation25_spill]]  ;;  %s863_s6 = scalar_lea.sflag [#allocation5], %s1738_s15 }
 0x26d   : > { %s1304_s21 = scalar_lea.vmem %s1879_s8, 512  ;;  %p2004_p0 = scmp.ne.s32.totalorder %s1992_s9, 0 }
 0x26e   : > { %p1305_p9 = scmp.ne.s32.totalorder %s1879_s8, %s1304_s21  ;;  %s1467_s2 = smov [#allocation9]  }
 0x26f   : > { %s1308_s29 = sshll.u32 %s1467_s2, 4  ;;  %s1309_s29 = int_to_ptr.vmem [resolvable:$false] %s1308_s29 }
 0x270   : > { %p1306_p6 = pnand %p1305_p9, %p2004_p0  ;;  %s1310_s18 = scalar_lea.vmem %s1309_s29, 1024 }
 0x271   : > { %s1072_s1 = sshll.u32 %s2001_s3, 8  ;;  %p1311_p1 = scmp.lt.s32.totalorder %s1879_s8, %s1309_s29 }
 0x272   : > { %s2003_s11 = smov %s2002_s27  ;;  %s1876_s24 = scalar_lea.hbm %s2002_s27, %s1072_s1 }
 0x273   : > { %p1307_p2 = pneg %p1306_p6  ;;  %p1312_p5 = scmp.lt.s32.totalorder %s1310_s18, %s1304_s21 }
 0x275   : > { %p1313_p3 = por %p1312_p5, %p1311_p1 }
 0x277   : > { %p1314_p10 = pnand %p1313_p3, %p1307_p2 }
 0x279   : > { %1317 = shalt.err (!%p1314_p10)
}
 0x27a   : > { %s1318_s10 = scalar_lea.hbm %s1876_s24, 512  ;;  %s1322_s5 = scalar_lea.hbm %s2003_s11, 1536 }
 0x27b   : > { %p1319_p12 = scmp.ne.s32.totalorder %s1876_s24, %s1318_s10  ;;  %p1323_p11 = scmp.lt.s32.totalorder %s1876_s24, %s2003_s11 }
 0x27c   : > { %p1324_p4 = scmp.lt.s32.totalorder %s1322_s5, %s1318_s10 }
 0x27d   : > { %p1320_p13 = pnand %p1319_p12, %p2004_p0 }
 0x27e   : > { %p1325_p8 = por %p1324_p4, %p1323_p11 }
 0x27f   : > { %p1321_p7 = pneg %p1320_p13 }
 0x281   : > { %p1326_p9 = pnand %p1325_p8, %p1321_p7 }
 0x283   : > { %1329 = shalt.err (!%p1326_p9)
}
 0x284   : > { %s1468_s0 = smov 256   ;;  %s1469_s26 = smov 768  }
 0x285   : > { %s1470_s27 = smov 16  }
 0x286   : > { %1080 = dma.vmem_to_hbm [thread:$0]  (%p2004_p0), %s1879_s8, 512, %s1876_s24, %s863_s6, %s1468_s0, %s1469_s26, %s1470_s27  }
 0x287 PF: > { %s2005_s21 = sld [smem:[#allocation14_spill]]  ;;  %p1097_p6 = scmp.ge.s32.totalorder %s1456_s28, 2 }
 0x288   : > { %p2006_p2 = scmp.ne.s32.totalorder %s1993_s12, 0 }
 0x28a   : > { %p1093_p1 = pnand %p1097_p6, %p2006_p2 }
 0x28c   : > { %p1094_p5 = pneg %p1093_p1 }
 0x28d   : > { %s894_s2 = sand.u32 1, %s2005_s21  }
 0x28e   : > { %s895_s29 = scalar_lea.sflag [#allocation5], %s894_s2 }
 0x28f   : > { %1399 = dma.done.wait (%p1094_p5), %s895_s29, 512  }
 0x290   : > { %1401 = vsyncadd (%p1094_p5), %s895_s29, 4294966784  ;;  %s23_s28 = sadd.s32 1, %s1456_s28   ;;  %s2008_s24 = sld [smem:[#allocation17_spill]] }
 0x291   : > { %p1909_p3 = scmp.ge.s32.totalorder %s23_s28, 11   ;;  %s2009_s9 = sld [smem:[#allocation18_spill]] }
 0x292   : > { %s2010_s26 = sld [smem:[#allocation19_spill]]  ;;  %s2013_s15 = smov %s1408_s16 }
 0x293   : > { %s2011_s27 = sld [smem:[#allocation20_spill]]  ;;  %s2014_s16 = smov %s1412_s17 }
 0x294   : > { %s2015_s17 = smov %s1679_s25  ;;  %s2016_s18 = smov %s1420_s19 }
 0x295   : > { %s2017_s19 = smov %s1424_s20  ;;  %s2018_s20 = smov %s1601_s14 }
 0x296   : > { %s2019_s21 = smov %s1432_s22  ;;  %s2020_s22 = smov %s1436_s23 }
 0x297   : > { %s2021_s23 = smov %s1632_s30  ;;  %s2022_s25 = smov %s2009_s9 }
 0x298   :  { %22 = sbr.rel (!%p1909_p3) target bundleno = 18 (0x12), region = 122 }
 0x29d   :  { %900 = vsyncpa [#allocation4], 1 }
 0x29e   :  { %902 = vsyncpa [#allocation4 + $0x1], 1 }
 0x29f   :  { %903 = vsyncpa [#allocation7], 1 }
 0x2a0   :  { %905 = vsyncpa [#allocation7 + $0x1], 1 }
 0x2a1   :  { %906 = vsyncpa [#allocation5], 1 }
 0x2a2   :  { %908 = vsyncpa [#allocation5 + $0x1], 1 }

</bundles_post_ra>
